<compile_context>
chip_gen: v6e
topology: v6e:2x2x1
jax: 0.10.0
libtpu: 0.0.40
codegen_flags: <defaults>
</compile_context>

<pallas_src>
import functools

import jax
import jax.numpy as jnp
from jax.experimental import pallas as pl
from jax.experimental.pallas import tpu as pltpu


def _round_up(n, m):
    return ((n + m - 1) // m) * m


def _invariant_spec(block_shape, index_map):
    """BlockSpec for a block whose index_map is constant across the grid.

    Single-buffer it when this Pallas build supports pipeline_mode (halves the VMEM
    footprint of the resident W tile); otherwise fall back to the default spec.
    """
    try:
        return pl.BlockSpec(block_shape, index_map, pipeline_mode=pl.Buffered(1))
    except Exception:  # older Pallas without pipeline_mode / Buffered
        return pl.BlockSpec(block_shape, index_map)


def _final_linear_obs_kernel(x_ref, wt_ref, b_ref, y_ref, pmask_ref):
    """One grid step: matmul + bias for a batch tile, plus this tile's observer partial."""
    x = x_ref[...]                                               # (TB, IN_p), native dtype

    # nn.Linear hot path: native-dtype operands, f32 MXU accumulator.
    acc = jnp.dot(x, wt_ref[...], preferred_element_type=jnp.float32)   # (TB, OUT_p) f32
    y_ref[...] = (acc + b_ref[...]).astype(y_ref.dtype)          # f32 epilogue, one downcast

    # Forward-hook statistic: sum over the batch tile of |x|, accumulated in f32.
    s = jnp.sum(jnp.abs(x).astype(jnp.float32), axis=0, keepdims=True)  # (1, IN_p)
    pmask_ref[...] = s.reshape(1, 1, -1)


@functools.partial(jax.jit, static_argnames=("batch_tile",))
def final_linear_observer(x, w, b, in_mask, *, batch_tile=256):
    """x: (B, IN), w: (OUT, IN) PyTorch layout, b: (OUT,), in_mask: (IN,) f32.

    Returns:
      y:            (B, OUT)  -- the nn.Linear output
      new_in_mask:  (IN,)     -- in_mask + |x|.sum(axis=0)  (forward-hook update)
    """
    B, IN = x.shape
    OUT, IN_w = w.shape
    assert IN_w == IN

    # Lane-dense padding (multiple-of-128 last dims) and sublane-aligned batch tile.
    IN_p = _round_up(IN, 128)
    OUT_p = _round_up(OUT, 128)
    sub = 8 if jnp.dtype(x.dtype).itemsize >= 4 else 16
    bt = min(_round_up(B, sub), _round_up(batch_tile, sub))
    B_p = _round_up(B, bt)
    num_tiles = B_p // bt

    # Zero padding is semantically inert: zero rows/cols contribute nothing to the
    # matmul or to the |x| sums; padded outputs are sliced off below.
    x_p = jnp.pad(x, ((0, B_p - B), (0, IN_p - IN)))
    wt_p = jnp.pad(w.T, ((0, IN_p - IN), (0, OUT_p - OUT)))             # (IN_p, OUT_p)
    b_p = jnp.pad(b.astype(jnp.float32), (0, OUT_p - OUT)).reshape(1, OUT_p)

    # VMEM budget: double-buffered x/y tiles + resident W (1-2 bufs) + small bits, +50%.
    xi = jnp.dtype(x.dtype).itemsize
    wi = jnp.dtype(w.dtype).itemsize
    est = (2 * bt * IN_p * xi + 2 * bt * OUT_p * xi
           + IN_p * OUT_p * wi + 2 * OUT_p * 4 + 2 * IN_p * 4)
    vmem_limit = max(32 << 20, int(est * 1.5) + (2 << 20))
    # TODO(synk): for very large final layers (IN_p*OUT_p*wi approaching v7x's 64 MiB
    # VMEM), add an OUT grid axis that tiles W instead of holding it fully resident.

    y_p, partials = pl.pallas_call(
        _final_linear_obs_kernel,
        out_shape=(
            jax.ShapeDtypeStruct((B_p, OUT_p), x.dtype),
            jax.ShapeDtypeStruct((num_tiles, 1, IN_p), jnp.float32),
        ),
        grid_spec=pltpu.PrefetchScalarGridSpec(
            num_scalar_prefetch=0,
            grid=(num_tiles,),
            in_specs=[
                pl.BlockSpec((bt, IN_p), lambda i: (i, 0)),           # x batch tile
                _invariant_spec((IN_p, OUT_p), lambda i: (0, 0)),     # W.T (resident)
                _invariant_spec((1, OUT_p), lambda i: (0, 0)),        # bias (resident)
            ],
            out_specs=[
                pl.BlockSpec((bt, OUT_p), lambda i: (i, 0)),          # y batch tile
                pl.BlockSpec((1, 1, IN_p), lambda i: (i, 0, 0)),      # observer partial
            ],
        ),
        compiler_params=pltpu.CompilerParams(
            dimension_semantics=("parallel",),   # no cross-step accumulator -> megacore OK
            vmem_limit_bytes=vmem_limit,
        ),
    )(x_p, wt_p, b_p)

    y = y_p[:B, :OUT]
    new_in_mask = in_mask.astype(jnp.float32) + jnp.sum(partials, axis=(0, 1))[:IN]
    return y, new_in_mask


if __name__ == "__main__":
    # Small shapes consistent with a final nn.Linear: batch=16, in=32, out=16.
    B, IN, OUT = 16, 32, 16
    key = jax.random.PRNGKey(0)
    kx, kw, kb = jax.random.split(key, 3)

    x = jax.random.normal(kx, (B, IN), dtype=jnp.float32)
    # Deterministic synthetic "nn.Linear" parameters (not a checkpoint).
    w = jax.random.normal(kw, (OUT, IN), dtype=jnp.float32) * 0.1
    b = jax.random.normal(kb, (OUT,), dtype=jnp.float32) * 0.1
    # __init__: self.in_mask = torch.ones(in_features)
    in_mask = jnp.ones((IN,), dtype=jnp.float32)

    y, new_mask = final_linear_observer(x, w, b, in_mask)
    jax.block_until_ready((y, new_mask))

    # Reference check (plain JAX).
    y_ref = x @ w.T + b
    mask_ref = in_mask + jnp.sum(jnp.abs(x), axis=0)
    assert jnp.allclose(y, y_ref, atol=1e-5, rtol=1e-5)
    assert jnp.allclose(new_mask, mask_ref, atol=1e-5, rtol=1e-5)

    print("KERNEL_OK")
</pallas_src>

<mosaic_0001>
module attributes {stable_mosaic.version = 11 : i64} {
  func.func @_final_linear_obs_kernel(%arg0: i32, %arg1: memref<16x128xf32, #tpu.memory_space<vmem>>, %arg2: memref<128x128xf32, #tpu.memory_space<vmem>>, %arg3: memref<1x128xf32, #tpu.memory_space<vmem>>, %arg4: memref<16x128xf32, #tpu.memory_space<vmem>>, %arg5: memref<1x1x128xf32, #tpu.memory_space<vmem>>) attributes {dimension_semantics = [#tpu.dimension_semantics<parallel>], iteration_bounds = array<i64: 1>, scalar_prefetch = 0 : i64, scratch_operands = 0 : i64, tpu.core_type = #tpu.core_type<tc>, window_params = [{transform_indices = @transform_0, window_bounds = array<i64: 16, 128>}, {pipeline_mode = #tpu.pipeline_mode<synchronous>, transform_indices = @transform_1, window_bounds = array<i64: 128, 128>}, {pipeline_mode = #tpu.pipeline_mode<synchronous>, transform_indices = @transform_2, window_bounds = array<i64: 1, 128>}, {transform_indices = @transform_3, window_bounds = array<i64: 16, 128>}, {transform_indices = @transform_4, window_bounds = array<i64: 1, 1, 128>}]} {
    %c0 = arith.constant 0 : index
    %c0_0 = arith.constant 0 : index
    %0 = vector.load %arg1[%c0, %c0_0] : memref<16x128xf32, #tpu.memory_space<vmem>>, vector<16x128xf32>
    %c0_1 = arith.constant 0 : index
    %c0_2 = arith.constant 0 : index
    %1 = vector.load %arg2[%c0_1, %c0_2] : memref<128x128xf32, #tpu.memory_space<vmem>>, vector<128x128xf32>
    %cst = arith.constant dense<0.000000e+00> : vector<16x128xf32>
    %2 = tpu.matmul %0, %1, %cst {dimension_numbers = #tpu.dot_dimension_numbers<[1], [0], [0], [1], [0, 0, 1, 1], [], []>} : vector<16x128xf32>, vector<128x128xf32>, vector<16x128xf32> -> vector<16x128xf32>
    %c0_3 = arith.constant 0 : index
    %c0_4 = arith.constant 0 : index
    %3 = vector.load %arg3[%c0_3, %c0_4] : memref<1x128xf32, #tpu.memory_space<vmem>>, vector<1x128xf32>
    %4 = vector.broadcast %3 : vector<1x128xf32> to vector<16x128xf32>
    %5 = arith.addf %2, %4 : vector<16x128xf32>
    %c0_5 = arith.constant 0 : index
    %c0_6 = arith.constant 0 : index
    %6 = vector.load %arg4[%c0_5, %c0_6] : memref<16x128xf32, #tpu.memory_space<vmem>>, vector<16x128xf32>
    tpu.vector_store %arg4[%c0_5, %c0_6], %5 {strides = array<i32>} : memref<16x128xf32, #tpu.memory_space<vmem>>, vector<16x128xf32>,
    %7 = math.absf %0 : vector<16x128xf32>
    %cst_7 = arith.constant dense<0.000000e+00> : vector<128xf32>
    %8 = vector.multi_reduction <add>, %7, %cst_7 [0] : vector<16x128xf32> to vector<128xf32>
    %9 = vector.shape_cast %8 : vector<128xf32> to vector<1x128xf32>
    %10 = vector.shape_cast %9 : vector<1x128xf32> to vector<1x1x128xf32>
    %c0_8 = arith.constant 0 : index
    %c0_9 = arith.constant 0 : index
    %c0_10 = arith.constant 0 : index
    %11 = vector.load %arg5[%c0_8, %c0_9, %c0_10] : memref<1x1x128xf32, #tpu.memory_space<vmem>>, vector<1x1x128xf32>
    tpu.vector_store %arg5[%c0_8, %c0_9, %c0_10], %10 {strides = array<i32>} : memref<1x1x128xf32, #tpu.memory_space<vmem>>, vector<1x1x128xf32>,
    return
  }
  func.func @transform_0(%arg0: i32) -> (i32, i32) {
    %c0_i32 = arith.constant 0 : i32
    %c0_i32_0 = arith.constant 0 : i32
    return %arg0, %c0_i32 : i32, i32
  }
  func.func @transform_1(%arg0: i32) -> (i32, i32) {
    %c0_i32 = arith.constant 0 : i32
    %c0_i32_0 = arith.constant 0 : i32
    %c0_i32_1 = arith.constant 0 : i32
    return %c0_i32, %c0_i32_0 : i32, i32
  }
  func.func @transform_2(%arg0: i32) -> (i32, i32) {
    %c0_i32 = arith.constant 0 : i32
    %c0_i32_0 = arith.constant 0 : i32
    %c0_i32_1 = arith.constant 0 : i32
    return %c0_i32, %c0_i32_0 : i32, i32
  }
  func.func @transform_3(%arg0: i32) -> (i32, i32) {
    %c0_i32 = arith.constant 0 : i32
    %c0_i32_0 = arith.constant 0 : i32
    return %arg0, %c0_i32 : i32, i32
  }
  func.func @transform_4(%arg0: i32) -> (i32, i32, i32) {
    %c0_i32 = arith.constant 0 : i32
    %c0_i32_0 = arith.constant 0 : i32
    %c0_i32_1 = arith.constant 0 : i32
    return %arg0, %c0_i32, %c0_i32_0 : i32, i32, i32
  }
}

</mosaic_0001>

<bundles_post_ra>
// kernel: final_linear_observer.1
= control target key start
LH: loop header
LB: loop body
LE: loop exit
PB: predicated region body
PF: predicated region fallthrough
CT: control target
= control target key end

     0   :  { %s319_s0 = inlined_call_operand.vmem [shape: f32[16,128], index: 0, kind: input, shape index: {}]   ;;  %s320_s1 = inlined_call_operand.vmem [shape: f32[128,128], index: 1, kind: input, shape index: {}]   ;;  %s321_s2 = inlined_call_operand.vmem [shape: f32[1,128], index: 2, kind: input, shape index: {}]   ;;  %s322_s3 = inlined_call_operand.hbm [shape: f32[16,128], index: 3, kind: output, shape index: {0}]   ;;  %s323_s4 = inlined_call_operand.vmem [shape: f32[1,1,128], index: 4, kind: output, shape index: {1}]  }
   0x1   :  { %v34_v0 = vld [vmem:[%s320_s1 + $0x78] sm:$0xff]  ;;  %v33_v1 = vld [vmem:[%s320_s1 + $0x70] sm:$0xff]  ;;  %v32_v2 = vld [vmem:[%s320_s1 + $0x68] sm:$0xff] }
   0x2   :  { %168 = vmatprep.subr.mxu0 %v34_v0  ;;  %v31_v3 = vld [vmem:[%s320_s1 + $0x60] sm:$0xff]  ;;  %v30_v4 = vld [vmem:[%s320_s1 + $0x58] sm:$0xff]  ;;  %v18_v6 = vld [vmem:[%s319_s0 + $0x8] sm:$0xff] }
   0x3   :  { %169 = vmatpush3.msra.mxu0 %v34_v0  ;;  %v17_v5 = vld [vmem:[%s319_s0] sm:$0xff]  ;;  %v120_v8 = vand.u32 2147483647, %v18_v6 }
   0x4   :  { %170 = vmatprep.subr.mxu0 %v33_v1  ;;  %200 = vmatprep.mubr.f32.mxu0 %v17_v5  ;;  %v119_v7 = vand.u32 2147483647, %v17_v5 }
   0x5   :  { %171 = vmatpush3.msra.mxu0 %v33_v1 }
   0x6   :  { %172 = vmatprep.subr.mxu0 %v32_v2 }
   0x7   :  { %173 = vmatpush3.msra.mxu0 %v32_v2 }
   0x8   :  { %10 = vsyncpa [#allocation3], 0  ;;  %174 = vmatprep.subr.mxu0 %v31_v3  ;;  %v29_v9 = vld [vmem:[%s320_s1 + $0x50] sm:$0xff]  ;;  %v121_v10 = vadd.f32 %v120_v8, %v119_v7  ;;  %v28_v11 = vld [vmem:[%s320_s1 + $0x48] sm:$0xff]  ;;  %s228_s27 = smov [#allocation2]  }
   0x9   :  { %175 = vmatpush3.msra.mxu0 %v31_v3  ;;  %v27_v13 = vld [vmem:[%s320_s1 + $0x40] sm:$0xff]  ;;  %v26_v15 = vld [vmem:[%s320_s1 + $0x38] sm:$0xff]  ;;  %v25_v17 = vld [vmem:[%s320_s1 + $0x30] sm:$0xff]  ;;  %s134_s28 = sshll.u32 %s228_s27, 4  ;;  %s135_s28 = int_to_ptr.vmem [resolvable:$true] %s134_s28 }
   0xa   :  { %176 = vmatprep.subr.mxu0 %v30_v4  ;;  %v122_v12 = vrot.slane %v121_v10, 4  ;;  %v24_v19 = vld [vmem:[%s320_s1 + $0x28] sm:$0xff]  ;;  %v23_v21 = vld [vmem:[%s320_s1 + $0x20] sm:$0xff]  ;;  %v22_v23 = vld [vmem:[%s320_s1 + $0x18] sm:$0xff]  ;;  %s206_s29 = scalar_lea.vmem %s135_s28, 256  ;;  %p211_p1 = scmp.lt.s32.totalorder %s135_s28, %s135_s28 }
   0xb   :  { %177 = vmatpush3.msra.mxu0 %v30_v4  ;;  %v21_v24 = vld [vmem:[%s320_s1 + $0x10] sm:$0xff]  ;;  %v20_v25 = vld [vmem:[%s320_s1 + $0x8] sm:$0xff]  ;;  %v19_v26 = vld [vmem:[%s320_s1] sm:$0xff]  ;;  %p207_p0 = scmp.ne.s32.totalorder %s135_s28, %s206_s29  ;;  %p212_p2 = scmp.lt.s32.totalorder %s206_s29, %s206_s29 }
   0xc   :  { %178 = vmatprep.subr.mxu0 %v29_v9  ;;  %v123_v14 = vadd.f32 %v122_v12, %v121_v10  ;;  %v149_v27 = vld [vmem:[%s321_s2] ss:$0 sm:$0xff] }
   0xd   :  { %179 = vmatpush3.msra.mxu0 %v29_v9  ;;  %p213_p3 = por %p212_p2, %p211_p1 }
   0xe   :  { %180 = vmatprep.subr.mxu0 %v28_v11  ;;  %v124_v16 = vrot.slane %v123_v14, 2 }
   0xf   :  { %181 = vmatpush3.msra.mxu0 %v28_v11  ;;  %p214_p4 = pnand %p213_p3, %p207_p0 }
  0x10   :  { %182 = vmatprep.subr.mxu0 %v27_v13  ;;  %v125_v18 = vadd.f32 %v124_v16, %v123_v14 }
  0x11   :  { %183 = vmatpush3.msra.mxu0 %v27_v13 }
  0x12   :  { %184 = vmatprep.subr.mxu0 %v26_v15  ;;  %v126_v20 = vrot.slane %v125_v18, 1 }
  0x13   :  { %185 = vmatpush3.msra.mxu0 %v26_v15 }
  0x14   :  { %186 = vmatprep.subr.mxu0 %v25_v17  ;;  %v127_v22 = vadd.f32 %v126_v20, %v125_v18 }
  0x15   :  { %187 = vmatpush3.msra.mxu0 %v25_v17 }
  0x16   :  { %188 = vmatprep.subr.mxu0 %v24_v19  ;;  %128 = vst [vmem:[%s323_s4] sm:$0x1] %v127_v22 }
  0x17   :  { %189 = vmatpush3.msra.mxu0 %v24_v19 }
  0x18   :  { %190 = vmatprep.subr.mxu0 %v23_v21 }
  0x19   :  { %191 = vmatpush3.msra.mxu0 %v23_v21 }
  0x1a   :  { %192 = vmatprep.subr.mxu0 %v22_v23 }
  0x1b   :  { %193 = vmatpush3.msra.mxu0 %v22_v23 }
  0x1c   :  { %194 = vmatprep.subr.mxu0 %v21_v24 }
  0x1d   :  { %195 = vmatpush3.msra.mxu0 %v21_v24 }
  0x1e   :  { %196 = vmatprep.subr.mxu0 %v20_v25 }
  0x1f   :  { %197 = vmatpush3.msra.mxu0 %v20_v25 }
  0x20   :  { %198 = vmatprep.subr.mxu0 %v19_v26 }
  0x21   :  { %199 = vmatpush3.msra.mxu0 %v19_v26 }
  0x22   :  { %201 = vmatmul.mubr.f32.vlgmr.msra.gmra.mxu0 %v18_v6 }
  0xe2   :  { %v202_v28 = vpop.f32.mrf.mxu0 }
  0xe3   :  { %v114_v29 = vadd.f32 %v202_v28, %v149_v27 }
  0xe4   :  { %v108_v30 = vpop.f32.mrf.mxu0 }
  0xe5   :  { %118 = vst [vmem:[#allocation2 + $0x8] sm:$0xff] %v114_v29  ;;  %v109_v31 = vadd.f32 %v149_v27, %v108_v30 }
  0xe7   :  { %117 = vst [vmem:[#allocation2] sm:$0xff] %v109_v31 }
  0xe8   :  { %217 = shalt.err (!%p214_p4)
}
  0xe9   :  { %s229_s1 = smov 128   ;;  %s230_s30 = smov 8  }
  0xea   :  { %140 = dma.vmem_to_hbm [thread:$0]  %s135_s28, 256, %s322_s3, [#allocation3], %s229_s1, %s229_s1, %s230_s30  }
  0xeb   :  { %226 = dma.done.wait [#allocation3], 256  }
  0xec   :  { %227 = vsyncadd [#allocation3], 4294967040 }
  0xed   :  { %148 = vsyncpa [#allocation3], 1 }

</bundles_post_ra>
